<compile_context>
chip_gen: v5e
topology: v5e:2x2
jax: 0.10.0
libtpu: 0.0.40
codegen_flags: <defaults>
</compile_context>

<pallas_src>
import jax
import jax.numpy as jnp
from jax.experimental import pallas as pl
from jax.experimental.pallas import tpu as pltpu

TimeStep = 8
Vth = 1.0
tau = 0.5

_LANES = 128
_MAX_TILE_R = 1024   # (8,1024,128) f32 block = 4 MiB/array; 16 MiB in+out double-buffered
_MIN_SPLIT_R = 128   # keep each per-timestep DMA chunk >= 128*512 B = 64 KiB when splitting


def _lif_kernel(x_ref, o_ref):
    # x_ref / o_ref: (TimeStep, tile_r, 128) blocks.  The full 8-step recurrence
    # runs inside one block; membrane potential `u` and previous spike stay in
    # registers (no VMEM scratch round-trip).
    shape = x_ref.shape[1:]
    u = jnp.zeros(shape, dtype=jnp.float32)
    spike = jnp.zeros(shape, dtype=jnp.bool_)
    for t in range(TimeStep):  # static unroll, TimeStep == 8
        x_t = x_ref[t].astype(jnp.float32)
        # If previous step spiked, membrane resets -> u = x_t; else decay + input.
        u = jnp.where(spike, x_t, tau * u + x_t)
        spike = u > Vth  # computed once, reused as next step's reset mask
        o_ref[t] = spike.astype(o_ref.dtype)


def _round_up(a, b):
    return ((a + b - 1) // b) * b


def _pick_tile_r(rows, sub):
    """rows is already a multiple of `sub` (the native sublane tile)."""
    if rows > _MAX_TILE_R:
        return _MAX_TILE_R
    # Small/medium input: try to give v7x's two TensorCores >= 2 blocks, but
    # never let per-timestep DMA chunks drop below ~64 KiB.
    half = _round_up((rows + 1) // 2, sub)
    if half >= _MIN_SPLIT_R:
        return half
    return rows


def lif_forward(x):
    """x: (TimeStep*bs, ...) -> o: same shape/dtype as x."""
    total_b = x.shape[0]
    assert total_b % TimeStep == 0, "leading dim must be TimeStep * bs"
    feat_shape = x.shape[1:]
    bs = total_b // TimeStep
    F = 1
    for d in feat_shape:
        F *= d
    N = bs * F
    out_dtype = x.dtype
    itemsize = jnp.dtype(out_dtype).itemsize
    sub = 8 * max(1, 4 // itemsize)  # native sublane tile: 8 f32, 16 bf16, 32 int8

    # Lane-dense layout: (TimeStep, rows, 128); rows rounded only to the sublane
    # multiple (NOT to a tile_r boundary) -- ragged last grid block is fine.
    rows = _round_up(pl.cdiv(N, _LANES), sub)
    n_pad = rows * _LANES

    x_flat = x.reshape(TimeStep, N)
    if n_pad != N:
        # Minimal padding (< sub*128 elements per step); zeros never spike.
        x_flat = jnp.pad(x_flat, ((0, 0), (0, n_pad - N)))
    x_tiled = x_flat.reshape(TimeStep, rows, _LANES)

    tile_r = _pick_tile_r(rows, sub)
    n_blocks = pl.cdiv(rows, tile_r)  # Pallas masks the ragged last block

    cost = pl.CostEstimate(
        flops=6 * TimeStep * rows * _LANES,
        transcendentals=0,
        bytes_accessed=2 * TimeStep * rows * _LANES * itemsize,
    )

    out = pl.pallas_call(
        _lif_kernel,
        out_shape=jax.ShapeDtypeStruct((TimeStep, rows, _LANES), out_dtype),
        grid_spec=pltpu.PrefetchScalarGridSpec(
            num_scalar_prefetch=0,
            grid=(n_blocks,),
            in_specs=[
                pl.BlockSpec((TimeStep, tile_r, _LANES), lambda f: (0, f, 0)),
            ],
            out_specs=pl.BlockSpec((TimeStep, tile_r, _LANES), lambda f: (0, f, 0)),
        ),
        compiler_params=pltpu.CompilerParams(
            dimension_semantics=("parallel",),
            # tile_r=1024 needs ~16 MiB (in+out, double-buffered); raise above
            # v5e's 16 MiB default scoped VMEM.  Physical VMEM >= 64 MiB on all gens.
            vmem_limit_bytes=32 << 20,
        ),
        cost_estimate=cost,
    )(x_tiled)

    out_flat = out.reshape(TimeStep, n_pad)
    if n_pad != N:
        out_flat = out_flat[:, :N]
    return out_flat.reshape((total_b,) + feat_shape)


def lif_reference(x):
    """Pure-JAX reference mirroring the PyTorch loop."""
    total_b = x.shape[0]
    bs = total_b // TimeStep
    u = jnp.zeros((bs,) + x.shape[1:], dtype=jnp.float32)
    outs = []
    for t in range(TimeStep):
        xt = x[t * bs:(t + 1) * bs].astype(jnp.float32)
        spike_prev = (u > Vth).astype(jnp.float32)
        u = tau * u * (1.0 - spike_prev) + xt
        outs.append((u > Vth).astype(x.dtype))
    return jnp.concatenate(outs, axis=0)


if __name__ == "__main__":
    key = jax.random.PRNGKey(0)
    bs, C, H, W = 2, 4, 16, 16
    # Input stacked along batch: (TimeStep*bs, C, H, W), scaled so some spikes fire.
    x = jax.random.uniform(key, (TimeStep * bs, C, H, W), dtype=jnp.float32) * 2.0

    o = lif_forward(x)
    o = jax.block_until_ready(o)

    o_ref = lif_reference(x)
    assert o.shape == x.shape
    assert o.dtype == x.dtype
    assert jnp.allclose(o, o_ref), "mismatch vs reference"

    print("KERNEL_OK")
</pallas_src>

<mosaic_0001>
module attributes {stable_mosaic.version = 11 : i64} {
  func.func @_lif_kernel(%arg0: i32, %arg1: memref<8x16x128xf32, #tpu.memory_space<vmem>>, %arg2: memref<8x16x128xf32, #tpu.memory_space<vmem>>) attributes {dimension_semantics = [#tpu.dimension_semantics<parallel>], iteration_bounds = array<i64: 1>, scalar_prefetch = 0 : i64, scratch_operands = 0 : i64, tpu.core_type = #tpu.core_type<tc>, window_params = [{transform_indices = @transform_0, window_bounds = array<i64: 8, 16, 128>}, {transform_indices = @transform_1, window_bounds = array<i64: 8, 16, 128>}]} {
    %cst = arith.constant 0.000000e+00 : f32
    %0 = vector.broadcast %cst : f32 to vector<16x128xf32>
    %false = arith.constant false
    %1 = vector.broadcast %false : i1 to vector<16x128xi1>
    %c0 = arith.constant 0 : index
    %c0_0 = arith.constant 0 : index
    %c0_1 = arith.constant 0 : index
    %2 = vector.load %arg1[%c0, %c0_0, %c0_1] : memref<8x16x128xf32, #tpu.memory_space<vmem>>, vector<1x16x128xf32>
    %3 = vector.shape_cast %2 : vector<1x16x128xf32> to vector<16x128xf32>
    %cst_2 = arith.constant 5.000000e-01 : f32
    %4 = vector.broadcast %cst_2 : f32 to vector<16x128xf32>
    %5 = arith.mulf %4, %0 : vector<16x128xf32>
    %6 = arith.addf %5, %3 : vector<16x128xf32>
    %7 = arith.select %1, %3, %6 : vector<16x128xi1>, vector<16x128xf32>
    %cst_3 = arith.constant 1.000000e+00 : f32
    %8 = vector.broadcast %cst_3 : f32 to vector<16x128xf32>
    %9 = arith.cmpf ogt, %7, %8 : vector<16x128xf32>
    %10 = arith.extui %9 : vector<16x128xi1> to vector<16x128xi32>
    %11 = arith.sitofp %10 : vector<16x128xi32> to vector<16x128xf32>
    %c0_4 = arith.constant 0 : index
    %c0_5 = arith.constant 0 : index
    %c0_6 = arith.constant 0 : index
    %12 = vector.load %arg2[%c0_4, %c0_5, %c0_6] : memref<8x16x128xf32, #tpu.memory_space<vmem>>, vector<1x16x128xf32>
    %13 = vector.shape_cast %12 : vector<1x16x128xf32> to vector<16x128xf32>
    %14 = vector.shape_cast %11 : vector<16x128xf32> to vector<1x16x128xf32>
    tpu.vector_store %arg2[%c0_4, %c0_5, %c0_6], %14 {strides = array<i32>} : memref<8x16x128xf32, #tpu.memory_space<vmem>>, vector<1x16x128xf32>,
    %c1 = arith.constant 1 : index
    %c0_7 = arith.constant 0 : index
    %c0_8 = arith.constant 0 : index
    %15 = vector.load %arg1[%c1, %c0_7, %c0_8] : memref<8x16x128xf32, #tpu.memory_space<vmem>>, vector<1x16x128xf32>
    %16 = vector.shape_cast %15 : vector<1x16x128xf32> to vector<16x128xf32>
    %cst_9 = arith.constant 5.000000e-01 : f32
    %17 = vector.broadcast %cst_9 : f32 to vector<16x128xf32>
    %18 = arith.mulf %17, %7 : vector<16x128xf32>
    %19 = arith.addf %18, %16 : vector<16x128xf32>
    %20 = arith.select %9, %16, %19 : vector<16x128xi1>, vector<16x128xf32>
    %cst_10 = arith.constant 1.000000e+00 : f32
    %21 = vector.broadcast %cst_10 : f32 to vector<16x128xf32>
    %22 = arith.cmpf ogt, %20, %21 : vector<16x128xf32>
    %23 = arith.extui %22 : vector<16x128xi1> to vector<16x128xi32>
    %24 = arith.sitofp %23 : vector<16x128xi32> to vector<16x128xf32>
    %c1_11 = arith.constant 1 : index
    %c0_12 = arith.constant 0 : index
    %c0_13 = arith.constant 0 : index
    %25 = vector.load %arg2[%c1_11, %c0_12, %c0_13] : memref<8x16x128xf32, #tpu.memory_space<vmem>>, vector<1x16x128xf32>
    %26 = vector.shape_cast %25 : vector<1x16x128xf32> to vector<16x128xf32>
    %27 = vector.shape_cast %24 : vector<16x128xf32> to vector<1x16x128xf32>
    tpu.vector_store %arg2[%c1_11, %c0_12, %c0_13], %27 {strides = array<i32>} : memref<8x16x128xf32, #tpu.memory_space<vmem>>, vector<1x16x128xf32>,
    %c2 = arith.constant 2 : index
    %c0_14 = arith.constant 0 : index
    %c0_15 = arith.constant 0 : index
    %28 = vector.load %arg1[%c2, %c0_14, %c0_15] : memref<8x16x128xf32, #tpu.memory_space<vmem>>, vector<1x16x128xf32>
    %29 = vector.shape_cast %28 : vector<1x16x128xf32> to vector<16x128xf32>
    %cst_16 = arith.constant 5.000000e-01 : f32
    %30 = vector.broadcast %cst_16 : f32 to vector<16x128xf32>
    %31 = arith.mulf %30, %20 : vector<16x128xf32>
    %32 = arith.addf %31, %29 : vector<16x128xf32>
    %33 = arith.select %22, %29, %32 : vector<16x128xi1>, vector<16x128xf32>
    %cst_17 = arith.constant 1.000000e+00 : f32
    %34 = vector.broadcast %cst_17 : f32 to vector<16x128xf32>
    %35 = arith.cmpf ogt, %33, %34 : vector<16x128xf32>
    %36 = arith.extui %35 : vector<16x128xi1> to vector<16x128xi32>
    %37 = arith.sitofp %36 : vector<16x128xi32> to vector<16x128xf32>
    %c2_18 = arith.constant 2 : index
    %c0_19 = arith.constant 0 : index
    %c0_20 = arith.constant 0 : index
    %38 = vector.load %arg2[%c2_18, %c0_19, %c0_20] : memref<8x16x128xf32, #tpu.memory_space<vmem>>, vector<1x16x128xf32>
    %39 = vector.shape_cast %38 : vector<1x16x128xf32> to vector<16x128xf32>
    %40 = vector.shape_cast %37 : vector<16x128xf32> to vector<1x16x128xf32>
    tpu.vector_store %arg2[%c2_18, %c0_19, %c0_20], %40 {strides = array<i32>} : memref<8x16x128xf32, #tpu.memory_space<vmem>>, vector<1x16x128xf32>,
    %c3 = arith.constant 3 : index
    %c0_21 = arith.constant 0 : index
    %c0_22 = arith.constant 0 : index
    %41 = vector.load %arg1[%c3, %c0_21, %c0_22] : memref<8x16x128xf32, #tpu.memory_space<vmem>>, vector<1x16x128xf32>
    %42 = vector.shape_cast %41 : vector<1x16x128xf32> to vector<16x128xf32>
    %cst_23 = arith.constant 5.000000e-01 : f32
    %43 = vector.broadcast %cst_23 : f32 to vector<16x128xf32>
    %44 = arith.mulf %43, %33 : vector<16x128xf32>
    %45 = arith.addf %44, %42 : vector<16x128xf32>
    %46 = arith.select %35, %42, %45 : vector<16x128xi1>, vector<16x128xf32>
    %cst_24 = arith.constant 1.000000e+00 : f32
    %47 = vector.broadcast %cst_24 : f32 to vector<16x128xf32>
    %48 = arith.cmpf ogt, %46, %47 : vector<16x128xf32>
    %49 = arith.extui %48 : vector<16x128xi1> to vector<16x128xi32>
    %50 = arith.sitofp %49 : vector<16x128xi32> to vector<16x128xf32>
    %c3_25 = arith.constant 3 : index
    %c0_26 = arith.constant 0 : index
    %c0_27 = arith.constant 0 : index
    %51 = vector.load %arg2[%c3_25, %c0_26, %c0_27] : memref<8x16x128xf32, #tpu.memory_space<vmem>>, vector<1x16x128xf32>
    %52 = vector.shape_cast %51 : vector<1x16x128xf32> to vector<16x128xf32>
    %53 = vector.shape_cast %50 : vector<16x128xf32> to vector<1x16x128xf32>
    tpu.vector_store %arg2[%c3_25, %c0_26, %c0_27], %53 {strides = array<i32>} : memref<8x16x128xf32, #tpu.memory_space<vmem>>, vector<1x16x128xf32>,
    %c4 = arith.constant 4 : index
    %c0_28 = arith.constant 0 : index
    %c0_29 = arith.constant 0 : index
    %54 = vector.load %arg1[%c4, %c0_28, %c0_29] : memref<8x16x128xf32, #tpu.memory_space<vmem>>, vector<1x16x128xf32>
    %55 = vector.shape_cast %54 : vector<1x16x128xf32> to vector<16x128xf32>
    %cst_30 = arith.constant 5.000000e-01 : f32
    %56 = vector.broadcast %cst_30 : f32 to vector<16x128xf32>
    %57 = arith.mulf %56, %46 : vector<16x128xf32>
    %58 = arith.addf %57, %55 : vector<16x128xf32>
    %59 = arith.select %48, %55, %58 : vector<16x128xi1>, vector<16x128xf32>
    %cst_31 = arith.constant 1.000000e+00 : f32
    %60 = vector.broadcast %cst_31 : f32 to vector<16x128xf32>
    %61 = arith.cmpf ogt, %59, %60 : vector<16x128xf32>
    %62 = arith.extui %61 : vector<16x128xi1> to vector<16x128xi32>
    %63 = arith.sitofp %62 : vector<16x128xi32> to vector<16x128xf32>
    %c4_32 = arith.constant 4 : index
    %c0_33 = arith.constant 0 : index
    %c0_34 = arith.constant 0 : index
    %64 = vector.load %arg2[%c4_32, %c0_33, %c0_34] : memref<8x16x128xf32, #tpu.memory_space<vmem>>, vector<1x16x128xf32>
    %65 = vector.shape_cast %64 : vector<1x16x128xf32> to vector<16x128xf32>
    %66 = vector.shape_cast %63 : vector<16x128xf32> to vector<1x16x128xf32>
    tpu.vector_store %arg2[%c4_32, %c0_33, %c0_34], %66 {strides = array<i32>} : memref<8x16x128xf32, #tpu.memory_space<vmem>>, vector<1x16x128xf32>,
    %c5 = arith.constant 5 : index
    %c0_35 = arith.constant 0 : index
    %c0_36 = arith.constant 0 : index
    %67 = vector.load %arg1[%c5, %c0_35, %c0_36] : memref<8x16x128xf32, #tpu.memory_space<vmem>>, vector<1x16x128xf32>
    %68 = vector.shape_cast %67 : vector<1x16x128xf32> to vector<16x128xf32>
    %cst_37 = arith.constant 5.000000e-01 : f32
    %69 = vector.broadcast %cst_37 : f32 to vector<16x128xf32>
    %70 = arith.mulf %69, %59 : vector<16x128xf32>
    %71 = arith.addf %70, %68 : vector<16x128xf32>
    %72 = arith.select %61, %68, %71 : vector<16x128xi1>, vector<16x128xf32>
    %cst_38 = arith.constant 1.000000e+00 : f32
    %73 = vector.broadcast %cst_38 : f32 to vector<16x128xf32>
    %74 = arith.cmpf ogt, %72, %73 : vector<16x128xf32>
    %75 = arith.extui %74 : vector<16x128xi1> to vector<16x128xi32>
    %76 = arith.sitofp %75 : vector<16x128xi32> to vector<16x128xf32>
    %c5_39 = arith.constant 5 : index
    %c0_40 = arith.constant 0 : index
    %c0_41 = arith.constant 0 : index
    %77 = vector.load %arg2[%c5_39, %c0_40, %c0_41] : memref<8x16x128xf32, #tpu.memory_space<vmem>>, vector<1x16x128xf32>
    %78 = vector.shape_cast %77 : vector<1x16x128xf32> to vector<16x128xf32>
    %79 = vector.shape_cast %76 : vector<16x128xf32> to vector<1x16x128xf32>
    tpu.vector_store %arg2[%c5_39, %c0_40, %c0_41], %79 {strides = array<i32>} : memref<8x16x128xf32, #tpu.memory_space<vmem>>, vector<1x16x128xf32>,
    %c6 = arith.constant 6 : index
    %c0_42 = arith.constant 0 : index
    %c0_43 = arith.constant 0 : index
    %80 = vector.load %arg1[%c6, %c0_42, %c0_43] : memref<8x16x128xf32, #tpu.memory_space<vmem>>, vector<1x16x128xf32>
    %81 = vector.shape_cast %80 : vector<1x16x128xf32> to vector<16x128xf32>
    %cst_44 = arith.constant 5.000000e-01 : f32
    %82 = vector.broadcast %cst_44 : f32 to vector<16x128xf32>
    %83 = arith.mulf %82, %72 : vector<16x128xf32>
    %84 = arith.addf %83, %81 : vector<16x128xf32>
    %85 = arith.select %74, %81, %84 : vector<16x128xi1>, vector<16x128xf32>
    %cst_45 = arith.constant 1.000000e+00 : f32
    %86 = vector.broadcast %cst_45 : f32 to vector<16x128xf32>
    %87 = arith.cmpf ogt, %85, %86 : vector<16x128xf32>
    %88 = arith.extui %87 : vector<16x128xi1> to vector<16x128xi32>
    %89 = arith.sitofp %88 : vector<16x128xi32> to vector<16x128xf32>
    %c6_46 = arith.constant 6 : index
    %c0_47 = arith.constant 0 : index
    %c0_48 = arith.constant 0 : index
    %90 = vector.load %arg2[%c6_46, %c0_47, %c0_48] : memref<8x16x128xf32, #tpu.memory_space<vmem>>, vector<1x16x128xf32>
    %91 = vector.shape_cast %90 : vector<1x16x128xf32> to vector<16x128xf32>
    %92 = vector.shape_cast %89 : vector<16x128xf32> to vector<1x16x128xf32>
    tpu.vector_store %arg2[%c6_46, %c0_47, %c0_48], %92 {strides = array<i32>} : memref<8x16x128xf32, #tpu.memory_space<vmem>>, vector<1x16x128xf32>,
    %c7 = arith.constant 7 : index
    %c0_49 = arith.constant 0 : index
    %c0_50 = arith.constant 0 : index
    %93 = vector.load %arg1[%c7, %c0_49, %c0_50] : memref<8x16x128xf32, #tpu.memory_space<vmem>>, vector<1x16x128xf32>
    %94 = vector.shape_cast %93 : vector<1x16x128xf32> to vector<16x128xf32>
    %cst_51 = arith.constant 5.000000e-01 : f32
    %95 = vector.broadcast %cst_51 : f32 to vector<16x128xf32>
    %96 = arith.mulf %95, %85 : vector<16x128xf32>
    %97 = arith.addf %96, %94 : vector<16x128xf32>
    %98 = arith.select %87, %94, %97 : vector<16x128xi1>, vector<16x128xf32>
    %cst_52 = arith.constant 1.000000e+00 : f32
    %99 = vector.broadcast %cst_52 : f32 to vector<16x128xf32>
    %100 = arith.cmpf ogt, %98, %99 : vector<16x128xf32>
    %101 = arith.extui %100 : vector<16x128xi1> to vector<16x128xi32>
    %102 = arith.sitofp %101 : vector<16x128xi32> to vector<16x128xf32>
    %c7_53 = arith.constant 7 : index
    %c0_54 = arith.constant 0 : index
    %c0_55 = arith.constant 0 : index
    %103 = vector.load %arg2[%c7_53, %c0_54, %c0_55] : memref<8x16x128xf32, #tpu.memory_space<vmem>>, vector<1x16x128xf32>
    %104 = vector.shape_cast %103 : vector<1x16x128xf32> to vector<16x128xf32>
    %105 = vector.shape_cast %102 : vector<16x128xf32> to vector<1x16x128xf32>
    tpu.vector_store %arg2[%c7_53, %c0_54, %c0_55], %105 {strides = array<i32>} : memref<8x16x128xf32, #tpu.memory_space<vmem>>, vector<1x16x128xf32>,
    return
  }
  func.func @transform_0(%arg0: i32) -> (i32, i32, i32) {
    %c0_i32 = arith.constant 0 : i32
    %c0_i32_0 = arith.constant 0 : i32
    %c0_i32_1 = arith.constant 0 : i32
    return %c0_i32, %arg0, %c0_i32_0 : i32, i32, i32
  }
  func.func @transform_1(%arg0: i32) -> (i32, i32, i32) {
    %c0_i32 = arith.constant 0 : i32
    %c0_i32_0 = arith.constant 0 : i32
    %c0_i32_1 = arith.constant 0 : i32
    return %c0_i32, %arg0, %c0_i32_0 : i32, i32, i32
  }
}

</mosaic_0001>

<bundles_post_ra>
// kernel: tpu_custom_call.1
= control target key start
LH: loop header
LB: loop body
LE: loop exit
PB: predicated region body
PF: predicated region fallthrough
CT: control target
= control target key end

     0   :  { %6 = vsyncpa [#allocation3], 0  ;;  %s298_s0 = inlined_call_operand.hbm [shape: f32[8,16,128], index: 0, kind: input, shape index: {}]   ;;  %s299_s1 = inlined_call_operand.hbm [shape: f32[8,16,128], index: 1, kind: output, shape index: {}]  }
   0x1   :  { %7 = vsyncpa [#allocation4], 0  ;;  %s12_s8 = sshll.u32 %s298_s0, 4  ;;  %s255_s9 = smov [#allocation2]   ;;  %s13_s8 = int_to_ptr.hbm [resolvable:$true] %s12_s8 }
   0x2   :  { %s14_s10 = sshll.u32 %s255_s9, 4  ;;  %s256_s11 = smov 128   ;;  %s15_s10 = int_to_ptr.vmem [resolvable:$true] %s14_s10 }
   0x3   :  { %s257_s12 = smov 8  }
   0x4   :  { %20 = dma.hbm_to_vmem [thread:$0]  %s13_s8, 2048, %s15_s10, [#allocation3], %s256_s11, %s256_s11, %s257_s12  }
   0x5   :  { %251 = dma.done.wait [#allocation3], 2048  }
   0x6   :  { %252 = vsyncadd [#allocation3], 4294965248  ;;  %v25_v0 = vld [vmem:[#allocation2] sm:$0xff]  ;;  %v26_v1 = vld [vmem:[#allocation2 + $0x8] sm:$0xff]  ;;  %v258_v6 = vmov 0.0   ;;  %s259_s0 = smov [#allocation5]  }
   0x7   :  { %v38_v2 = vld [vmem:[#allocation2 + $0x10] sm:$0xff]  ;;  %vm29_vm0 = vcmp.gt.f32.partialorder %v25_v0, 1.0  ;;  %v40_v3 = vmul.f32 0.5, %v25_v0  ;;  %vm30_vm1 = vcmp.gt.f32.partialorder %v26_v1, 1.0  ;;  %v41_v4 = vmul.f32 0.5, %v26_v1  ;;  %v39_v5 = vld [vmem:[#allocation2 + $0x18] sm:$0xff] }
   0x8   :  { %v182_v7 = vsel %vm29_vm0, 1.0, %v258_v6  ;;  %v183_v8 = vsel %vm30_vm1, 1.0, %v258_v6  ;;  %v56_v13 = vld [vmem:[#allocation2 + $0x20] sm:$0xff]  ;;  %v57_v14 = vld [vmem:[#allocation2 + $0x28] sm:$0xff]  ;;  %v74_v23 = vld [vmem:[#allocation2 + $0x30] sm:$0xff]  ;;  %s167_s13 = sshll.u32 %s259_s0, 4  ;;  %s168_s13 = int_to_ptr.vmem [resolvable:$true] %s167_s13 }
   0x9   :  { %35 = vst [vmem:[#allocation5] sm:$0xff] %v182_v7  ;;  %v42_v9 = vadd.f32 %v40_v3, %v38_v2  ;;  %v43_v10 = vadd.f32 %v41_v4, %v39_v5  ;;  %v75_v24 = vld [vmem:[#allocation2 + $0x38] sm:$0xff]  ;;  %v92_v33 = vld [vmem:[#allocation2 + $0x40] sm:$0xff]  ;;  %v93_v34 = vld [vmem:[#allocation2 + $0x48] sm:$0xff]  ;;  %s169_s16 = sshll.u32 %s299_s1, 4  ;;  %s170_s16 = int_to_ptr.hbm [resolvable:$true] %s169_s16 }
   0xa   :  { %36 = vst [vmem:[#allocation5 + $0x8] sm:$0xff] %v183_v8  ;;  %v110_v43 = vld [vmem:[#allocation2 + $0x50] sm:$0xff]  ;;  %v111_v44 = vld [vmem:[#allocation2 + $0x58] sm:$0xff]  ;;  %v128_v53 = vld [vmem:[#allocation2 + $0x60] sm:$0xff] }
   0xb   :  { %v44_v11 = vsel %vm29_vm0, %v38_v2, %v42_v9  ;;  %v45_v12 = vsel %vm30_vm1, %v39_v5, %v43_v10  ;;  %v129_v54 = vld [vmem:[#allocation2 + $0x68] sm:$0xff]  ;;  %v146_v63 = vld [vmem:[#allocation2 + $0x70] sm:$0xff]  ;;  %v147_v0 = vld [vmem:[#allocation2 + $0x78] sm:$0xff] }
   0xc   :  { %vm46_vm2 = vcmp.gt.f32.partialorder %v44_v11, 1.0  ;;  %v58_v15 = vmul.f32 0.5, %v44_v11  ;;  %vm47_vm3 = vcmp.gt.f32.partialorder %v45_v12, 1.0  ;;  %v59_v16 = vmul.f32 0.5, %v45_v12 }
   0xd   :  { %v184_v17 = vsel %vm46_vm2, 1.0, %v258_v6  ;;  %v185_v18 = vsel %vm47_vm3, 1.0, %v258_v6 }
   0xe   :  { %53 = vst [vmem:[#allocation5 + $0x10] sm:$0xff] %v184_v17  ;;  %v60_v19 = vadd.f32 %v58_v15, %v56_v13  ;;  %v61_v20 = vadd.f32 %v59_v16, %v57_v14 }
   0xf   :  { %54 = vst [vmem:[#allocation5 + $0x18] sm:$0xff] %v185_v18 }
  0x10   :  { %v62_v21 = vsel %vm46_vm2, %v56_v13, %v60_v19  ;;  %v63_v22 = vsel %vm47_vm3, %v57_v14, %v61_v20 }
  0x11   :  { %vm64_vm4 = vcmp.gt.f32.partialorder %v62_v21, 1.0  ;;  %v76_v25 = vmul.f32 0.5, %v62_v21  ;;  %vm65_vm5 = vcmp.gt.f32.partialorder %v63_v22, 1.0  ;;  %v77_v26 = vmul.f32 0.5, %v63_v22 }
  0x12   :  { %v186_v27 = vsel %vm64_vm4, 1.0, %v258_v6  ;;  %v187_v28 = vsel %vm65_vm5, 1.0, %v258_v6 }
  0x13   :  { %71 = vst [vmem:[#allocation5 + $0x20] sm:$0xff] %v186_v27  ;;  %v78_v29 = vadd.f32 %v76_v25, %v74_v23  ;;  %v79_v30 = vadd.f32 %v77_v26, %v75_v24 }
  0x14   :  { %72 = vst [vmem:[#allocation5 + $0x28] sm:$0xff] %v187_v28 }
  0x15   :  { %v80_v31 = vsel %vm64_vm4, %v74_v23, %v78_v29  ;;  %v81_v32 = vsel %vm65_vm5, %v75_v24, %v79_v30 }
  0x16   :  { %vm82_vm6 = vcmp.gt.f32.partialorder %v80_v31, 1.0  ;;  %v94_v35 = vmul.f32 0.5, %v80_v31  ;;  %vm83_vm7 = vcmp.gt.f32.partialorder %v81_v32, 1.0  ;;  %v95_v36 = vmul.f32 0.5, %v81_v32 }
  0x17   :  { %v188_v37 = vsel %vm82_vm6, 1.0, %v258_v6  ;;  %v189_v38 = vsel %vm83_vm7, 1.0, %v258_v6 }
  0x18   :  { %89 = vst [vmem:[#allocation5 + $0x30] sm:$0xff] %v188_v37  ;;  %v96_v39 = vadd.f32 %v94_v35, %v92_v33  ;;  %v97_v40 = vadd.f32 %v95_v36, %v93_v34 }
  0x19   :  { %90 = vst [vmem:[#allocation5 + $0x38] sm:$0xff] %v189_v38 }
  0x1a   :  { %v98_v41 = vsel %vm82_vm6, %v92_v33, %v96_v39  ;;  %v99_v42 = vsel %vm83_vm7, %v93_v34, %v97_v40 }
  0x1b   :  { %vm100_vm8 = vcmp.gt.f32.partialorder %v98_v41, 1.0  ;;  %v112_v45 = vmul.f32 0.5, %v98_v41  ;;  %vm101_vm9 = vcmp.gt.f32.partialorder %v99_v42, 1.0  ;;  %v113_v46 = vmul.f32 0.5, %v99_v42 }
  0x1c   :  { %v190_v47 = vsel %vm100_vm8, 1.0, %v258_v6  ;;  %v191_v48 = vsel %vm101_vm9, 1.0, %v258_v6 }
  0x1d   :  { %107 = vst [vmem:[#allocation5 + $0x40] sm:$0xff] %v190_v47  ;;  %v114_v49 = vadd.f32 %v112_v45, %v110_v43  ;;  %v115_v50 = vadd.f32 %v113_v46, %v111_v44 }
  0x1e   :  { %108 = vst [vmem:[#allocation5 + $0x48] sm:$0xff] %v191_v48 }
  0x1f   :  { %v116_v51 = vsel %vm100_vm8, %v110_v43, %v114_v49  ;;  %v117_v52 = vsel %vm101_vm9, %v111_v44, %v115_v50 }
  0x20   :  { %vm118_vm10 = vcmp.gt.f32.partialorder %v116_v51, 1.0  ;;  %v130_v55 = vmul.f32 0.5, %v116_v51  ;;  %vm119_vm11 = vcmp.gt.f32.partialorder %v117_v52, 1.0  ;;  %v131_v56 = vmul.f32 0.5, %v117_v52 }
  0x21   :  { %v192_v57 = vsel %vm118_vm10, 1.0, %v258_v6  ;;  %v193_v58 = vsel %vm119_vm11, 1.0, %v258_v6 }
  0x22   :  { %125 = vst [vmem:[#allocation5 + $0x50] sm:$0xff] %v192_v57  ;;  %v132_v59 = vadd.f32 %v130_v55, %v128_v53  ;;  %v133_v60 = vadd.f32 %v131_v56, %v129_v54 }
  0x23   :  { %126 = vst [vmem:[#allocation5 + $0x58] sm:$0xff] %v193_v58 }
  0x24   :  { %v134_v61 = vsel %vm118_vm10, %v128_v53, %v132_v59  ;;  %v135_v62 = vsel %vm119_vm11, %v129_v54, %v133_v60 }
  0x25   :  { %vm136_vm12 = vcmp.gt.f32.partialorder %v134_v61, 1.0  ;;  %v148_v1 = vmul.f32 0.5, %v134_v61  ;;  %vm137_vm13 = vcmp.gt.f32.partialorder %v135_v62, 1.0  ;;  %v149_v2 = vmul.f32 0.5, %v135_v62 }
  0x26   :  { %v194_v3 = vsel %vm136_vm12, 1.0, %v258_v6  ;;  %v195_v4 = vsel %vm137_vm13, 1.0, %v258_v6 }
  0x27   :  { %143 = vst [vmem:[#allocation5 + $0x60] sm:$0xff] %v194_v3  ;;  %v150_v5 = vadd.f32 %v148_v1, %v146_v63  ;;  %v151_v7 = vadd.f32 %v149_v2, %v147_v0 }
  0x28   :  { %144 = vst [vmem:[#allocation5 + $0x68] sm:$0xff] %v195_v4 }
  0x29   :  { %v152_v8 = vsel %vm136_vm12, %v146_v63, %v150_v5  ;;  %v153_v9 = vsel %vm137_vm13, %v147_v0, %v151_v7 }
  0x2a   :  { %vm154_vm14 = vcmp.gt.f32.partialorder %v152_v8, 1.0  ;;  %vm155_vm15 = vcmp.gt.f32.partialorder %v153_v9, 1.0 }
  0x2b   :  { %v196_v10 = vsel %vm154_vm14, 1.0, %v258_v6  ;;  %v197_v11 = vsel %vm155_vm15, 1.0, %v258_v6 }
  0x2c   :  { %161 = vst [vmem:[#allocation5 + $0x70] sm:$0xff] %v196_v10 }
  0x2d   :  { %162 = vst [vmem:[#allocation5 + $0x78] sm:$0xff] %v197_v11 }
  0x2e   :  { %175 = dma.vmem_to_hbm [thread:$0]  %s168_s13, 2048, %s170_s16, [#allocation4], %s256_s11, %s256_s11, %s257_s12  }
  0x2f   :  { %253 = dma.done.wait [#allocation4], 2048  }
  0x30   :  { %254 = vsyncadd [#allocation4], 4294965248 }
  0x31   :  { %180 = vsyncpa [#allocation3], 1 }
  0x32   :  { %181 = vsyncpa [#allocation4], 1 }

</bundles_post_ra>
